<compile_context>
chip_gen: v7x
topology: tpu7x:2x2x1
jax: 0.10.0
libtpu: 0.0.40
codegen_flags: <defaults>
</compile_context>

<pallas_src>
import functools
import math

import jax
import jax.numpy as jnp
from jax.experimental import pallas as pl
from jax.experimental.pallas import tpu as pltpu


# ----------------------------------------------------------------------------
# Pallas kernel: per-sample weight embedding + per-sample linear
# ----------------------------------------------------------------------------
def _hyper_linear_kernel(x_ref, w1_ref, wemb_ref, wbase_ref, bias_ref, o_ref, *, tb):
    # x_ref    : (tb, 1, IN)    per-sample input rows
    # w1_ref   : (tb, IN, MID)  first-stage hypernet output (reshaped)
    # wemb_ref : (MID, OUT)     fc_w_embed.weight^T        (constant)
    # wbase_ref: (IN, OUT)      target.weight^T + fc_w_embed.bias (constant, folded)
    # bias_ref : (tb, 1, OUT)   target.bias + db           (per sample, folded)
    # o_ref    : (tb, 1, OUT)
    wemb = wemb_ref[...]            # hoisted: shared by all tb samples
    wbase = wbase_ref[...]

    for b in range(tb):             # static unroll over the batch tile
        # Per-sample full (transposed) weight: W_b^T = W_base^T + w1_b @ Wemb^T + b_emb
        wt = jnp.dot(w1_ref[b], wemb, preferred_element_type=jnp.float32) + wbase   # (IN, OUT)
        # Per-sample linear: y_b = x_b @ W_b^T + bias_b
        y = jnp.dot(x_ref[b], wt, preferred_element_type=jnp.float32) + bias_ref[b]  # (1, OUT)
        o_ref[b] = y.astype(o_ref.dtype)


# ----------------------------------------------------------------------------
# Wrapper: hypernet first-stage glue (tiny linears) + pallas_call
# ----------------------------------------------------------------------------
def hyper_linear(x, h, params, index, *, tb=1):
    B, IN = x.shape
    OUT, MID = params["w_embed_w"].shape
    assert B % tb == 0, "batch must be divisible by the batch tile"

    f32 = jnp.float32

    # --- first-stage hypernet linears (tiny: n_params -> IN*MID / OUT); XLA glue
    w1 = (h @ params["w_param_w"].T + params["w_param_b"]
          + index @ params["w_index_w"].T + params["w_index_b"])          # (B, IN*MID)
    w1 = w1.reshape(B, IN, MID).astype(f32)                               # (B, IN, MID)

    db = (h @ params["b_param_w"].T + params["b_param_b"]
          + index @ params["b_index_w"].T + params["b_index_b"])          # (B, OUT)
    bias = (params["fc_b"][None, :] + db).astype(f32)                     # (B, OUT)

    # --- fold constants: W_base^T + fc_w_embed.bias (broadcast over IN rows)
    wembT = params["w_embed_w"].T.astype(f32)                             # (MID, OUT)
    wbase = (params["fc_w"].T + params["w_embed_b"][None, :]).astype(f32)  # (IN, OUT)

    x3 = x.reshape(B, 1, IN).astype(f32)
    bias3 = bias.reshape(B, 1, OUT)

    kernel = functools.partial(_hyper_linear_kernel, tb=tb)

    out = pl.pallas_call(
        kernel,
        out_shape=jax.ShapeDtypeStruct((B, 1, OUT), f32),
        grid=(B // tb,),
        in_specs=[
            pl.BlockSpec((tb, 1, IN), lambda b: (b, 0, 0)),      # x rows
            pl.BlockSpec((tb, IN, MID), lambda b: (b, 0, 0)),    # w1 (hot input)
            pl.BlockSpec((MID, OUT), lambda b: (0, 0)),          # embed weight (resident)
            pl.BlockSpec((IN, OUT), lambda b: (0, 0)),           # folded base weight (resident)
            pl.BlockSpec((tb, 1, OUT), lambda b: (b, 0, 0)),     # folded bias
        ],
        out_specs=pl.BlockSpec((tb, 1, OUT), lambda b: (b, 0, 0)),
        compiler_params=pltpu.CompilerParams(
            dimension_semantics=("parallel",)),                  # megacore on v7x
    )(x3, w1, wembT, wbase, bias3)

    return out.reshape(B, OUT)


# ----------------------------------------------------------------------------
# Deterministic parameter init (shapes match the PyTorch module __init__)
# ----------------------------------------------------------------------------
def init_params(key, *, n_params, n_layers, in_features, out_features, mid_channels):
    def xavier_normal(key, shape, gain):
        fan_out, fan_in = shape
        std = gain * math.sqrt(2.0 / (fan_in + fan_out))
        return std * jax.random.normal(key, shape, jnp.float32)

    def uniform_bias(key, shape, fan_in):
        bound = 1.0 / math.sqrt(fan_in)
        return jax.random.uniform(key, shape, jnp.float32, -bound, bound)

    ks = jax.random.split(key, 12)
    WMID = mid_channels * in_features
    return {
        # target Linear(in, out), xavier_normal_(gain=1)
        "fc_w": xavier_normal(ks[0], (out_features, in_features), 1.0),
        "fc_b": uniform_bias(ks[1], (out_features,), in_features),
        # HyperLinearEmbedder linears, xavier_normal_(gain=2e-6) (module overrides)
        "w_param_w": xavier_normal(ks[2], (WMID, n_params), 2e-6),
        "w_param_b": uniform_bias(ks[3], (WMID,), n_params),
        "w_index_w": xavier_normal(ks[4], (WMID, n_layers), 2e-6),
        "w_index_b": uniform_bias(ks[5], (WMID,), n_layers),
        "w_embed_w": xavier_normal(ks[6], (out_features, mid_channels), 2e-6),
        "w_embed_b": uniform_bias(ks[7], (out_features,), mid_channels),
        "b_param_w": xavier_normal(ks[8], (out_features, n_params), 2e-6),
        "b_param_b": uniform_bias(ks[9], (out_features,), n_params),
        "b_index_w": xavier_normal(ks[10], (out_features, n_layers), 2e-6),
        "b_index_b": uniform_bias(ks[11], (out_features,), n_layers),
    }


# ----------------------------------------------------------------------------
# Pure-JAX reference following the PyTorch forward literally
# ----------------------------------------------------------------------------
def reference(x, h, params, index):
    B, IN = x.shape
    OUT, MID = params["w_embed_w"].shape

    # HyperLinearEmbedder
    w = (h @ params["w_param_w"].T + params["w_param_b"]
         + index @ params["w_index_w"].T + params["w_index_b"])     # (B, MID*IN)
    w = w.reshape(B, IN, MID)
    w = w @ params["w_embed_w"].T + params["w_embed_b"]             # (B, IN, OUT)
    w = jnp.swapaxes(w, -2, -1)                                     # (B, OUT, IN)
    b = (h @ params["b_param_w"].T + params["b_param_b"]
         + index @ params["b_index_w"].T + params["b_index_b"])     # (B, OUT)

    # HyperLinear: per-sample weights/bias, grouped-conv == per-sample matmul
    weights = params["fc_w"][None] + w                              # (B, OUT, IN)
    bias = params["fc_b"][None] + b                                 # (B, OUT)
    y = jnp.einsum("boi,bi->bo", weights, x) + bias
    return y


# ----------------------------------------------------------------------------
if __name__ == "__main__":
    B = 2
    n_params, n_layers = 8, 3
    in_features, out_features, mid_channels = 32, 32, 64

    key = jax.random.PRNGKey(0)
    k_x, k_h, k_p = jax.random.split(key, 3)

    x = jax.random.normal(k_x, (B, in_features), jnp.float32)
    h = jax.random.normal(k_h, (B, n_params), jnp.float32)
    index = jnp.zeros((n_layers,), jnp.float32).at[1].set(1.0)      # one-hot layer index
    params = init_params(k_p, n_params=n_params, n_layers=n_layers,
                         in_features=in_features, out_features=out_features,
                         mid_channels=mid_channels)

    out = hyper_linear(x, h, params, index, tb=1)
    out = jax.block_until_ready(out)

    ref = reference(x, h, params, index)
    assert out.shape == (B, out_features)
    assert jnp.allclose(out, ref, rtol=1e-5, atol=1e-5), \
        f"max err {jnp.max(jnp.abs(out - ref))}"

    print("KERNEL_OK")
</pallas_src>

<mosaic_0001>
module attributes {stable_mosaic.version = 11 : i64} {
  func.func @_hyper_linear_kernel(%arg0: i32, %arg1: memref<1x1x32xf32, #tpu.memory_space<vmem>>, %arg2: memref<1x32x64xf32, #tpu.memory_space<vmem>>, %arg3: memref<64x32xf32, #tpu.memory_space<vmem>>, %arg4: memref<32x32xf32, #tpu.memory_space<vmem>>, %arg5: memref<1x1x32xf32, #tpu.memory_space<vmem>>, %arg6: memref<1x1x32xf32, #tpu.memory_space<vmem>>) attributes {dimension_semantics = [#tpu.dimension_semantics<parallel>], iteration_bounds = array<i64: 2>, scalar_prefetch = 0 : i64, scratch_operands = 0 : i64, tpu.core_type = #tpu.core_type<tc>, window_params = [{transform_indices = @transform_0, window_bounds = array<i64: 1, 1, 32>}, {transform_indices = @transform_1, window_bounds = array<i64: 1, 32, 64>}, {pipeline_mode = #tpu.pipeline_mode<synchronous>, transform_indices = @transform_2, window_bounds = array<i64: 64, 32>}, {pipeline_mode = #tpu.pipeline_mode<synchronous>, transform_indices = @transform_3, window_bounds = array<i64: 32, 32>}, {transform_indices = @transform_4, window_bounds = array<i64: 1, 1, 32>}, {transform_indices = @transform_5, window_bounds = array<i64: 1, 1, 32>}]} {
    %c0 = arith.constant 0 : index
    %c0_0 = arith.constant 0 : index
    %0 = vector.load %arg3[%c0, %c0_0] : memref<64x32xf32, #tpu.memory_space<vmem>>, vector<64x32xf32>
    %c0_1 = arith.constant 0 : index
    %c0_2 = arith.constant 0 : index
    %1 = vector.load %arg4[%c0_1, %c0_2] : memref<32x32xf32, #tpu.memory_space<vmem>>, vector<32x32xf32>
    %c0_3 = arith.constant 0 : index
    %c0_4 = arith.constant 0 : index
    %c0_5 = arith.constant 0 : index
    %2 = vector.load %arg2[%c0_3, %c0_4, %c0_5] : memref<1x32x64xf32, #tpu.memory_space<vmem>>, vector<1x32x64xf32>
    %3 = vector.shape_cast %2 : vector<1x32x64xf32> to vector<32x64xf32>
    %cst = arith.constant dense<0.000000e+00> : vector<32x32xf32>
    %4 = tpu.matmul %3, %0, %cst {dimension_numbers = #tpu.dot_dimension_numbers<[1], [0], [0], [1], [0, 0, 1, 1], [], []>} : vector<32x64xf32>, vector<64x32xf32>, vector<32x32xf32> -> vector<32x32xf32>
    %5 = arith.addf %4, %1 : vector<32x32xf32>
    %c0_6 = arith.constant 0 : index
    %c0_7 = arith.constant 0 : index
    %c0_8 = arith.constant 0 : index
    %6 = vector.load %arg1[%c0_6, %c0_7, %c0_8] : memref<1x1x32xf32, #tpu.memory_space<vmem>>, vector<1x1x32xf32>
    %7 = vector.shape_cast %6 : vector<1x1x32xf32> to vector<1x32xf32>
    %cst_9 = arith.constant dense<0.000000e+00> : vector<1x32xf32>
    %8 = tpu.matmul %7, %5, %cst_9 {dimension_numbers = #tpu.dot_dimension_numbers<[1], [0], [0], [1], [0, 0, 1, 1], [], []>} : vector<1x32xf32>, vector<32x32xf32>, vector<1x32xf32> -> vector<1x32xf32>
    %c0_10 = arith.constant 0 : index
    %c0_11 = arith.constant 0 : index
    %c0_12 = arith.constant 0 : index
    %9 = vector.load %arg5[%c0_10, %c0_11, %c0_12] : memref<1x1x32xf32, #tpu.memory_space<vmem>>, vector<1x1x32xf32>
    %10 = vector.shape_cast %9 : vector<1x1x32xf32> to vector<1x32xf32>
    %11 = arith.addf %8, %10 : vector<1x32xf32>
    %c0_13 = arith.constant 0 : index
    %c0_14 = arith.constant 0 : index
    %c0_15 = arith.constant 0 : index
    %12 = vector.load %arg6[%c0_13, %c0_14, %c0_15] : memref<1x1x32xf32, #tpu.memory_space<vmem>>, vector<1x1x32xf32>
    %13 = vector.shape_cast %12 : vector<1x1x32xf32> to vector<1x32xf32>
    %14 = vector.shape_cast %11 : vector<1x32xf32> to vector<1x1x32xf32>
    tpu.vector_store %arg6[%c0_13, %c0_14, %c0_15], %14 {strides = array<i32>} : memref<1x1x32xf32, #tpu.memory_space<vmem>>, vector<1x1x32xf32>,
    return
  }
  func.func @transform_0(%arg0: i32) -> (i32, i32, i32) {
    %c0_i32 = arith.constant 0 : i32
    %c0_i32_0 = arith.constant 0 : i32
    %c0_i32_1 = arith.constant 0 : i32
    return %arg0, %c0_i32, %c0_i32_0 : i32, i32, i32
  }
  func.func @transform_1(%arg0: i32) -> (i32, i32, i32) {
    %c0_i32 = arith.constant 0 : i32
    %c0_i32_0 = arith.constant 0 : i32
    %c0_i32_1 = arith.constant 0 : i32
    return %arg0, %c0_i32, %c0_i32_0 : i32, i32, i32
  }
  func.func @transform_2(%arg0: i32) -> (i32, i32) {
    %c0_i32 = arith.constant 0 : i32
    %c0_i32_0 = arith.constant 0 : i32
    %c0_i32_1 = arith.constant 0 : i32
    return %c0_i32, %c0_i32_0 : i32, i32
  }
  func.func @transform_3(%arg0: i32) -> (i32, i32) {
    %c0_i32 = arith.constant 0 : i32
    %c0_i32_0 = arith.constant 0 : i32
    %c0_i32_1 = arith.constant 0 : i32
    return %c0_i32, %c0_i32_0 : i32, i32
  }
  func.func @transform_4(%arg0: i32) -> (i32, i32, i32) {
    %c0_i32 = arith.constant 0 : i32
    %c0_i32_0 = arith.constant 0 : i32
    %c0_i32_1 = arith.constant 0 : i32
    return %arg0, %c0_i32, %c0_i32_0 : i32, i32, i32
  }
  func.func @transform_5(%arg0: i32) -> (i32, i32, i32) {
    %c0_i32 = arith.constant 0 : i32
    %c0_i32_0 = arith.constant 0 : i32
    %c0_i32_1 = arith.constant 0 : i32
    return %arg0, %c0_i32, %c0_i32_0 : i32, i32, i32
  }
}

</mosaic_0001>

<bundles_post_ra>
// kernel: tpu_custom_call.1
= control target key start
LH: loop header
LB: loop body
LE: loop exit
PB: predicated region body
PF: predicated region fallthrough
CT: control target
= control target key end

     0   :  { %10 = vsyncpa [#allocation3], 0  ;;  %s906_s0 = inlined_call_operand.vmem [shape: f32[2,1,32], index: 0, kind: input, shape index: {}]   ;;  %s907_s1 = inlined_call_operand.vmem [shape: f32[2,32,64], index: 1, kind: input, shape index: {}]   ;;  %s908_s2 = inlined_call_operand.vmem [shape: f32[64,32], index: 2, kind: input, shape index: {}]   ;;  %s909_s3 = inlined_call_operand.vmem [shape: f32[32,32], index: 3, kind: input, shape index: {}]   ;;  %s910_s4 = inlined_call_operand.vmem [shape: f32[2,1,32], index: 4, kind: input, shape index: {}]   ;;  %s911_s5 = inlined_call_operand.hbm [shape: f32[2,1,32], index: 5, kind: output, shape index: {}]  }
   0x1   :  { %12 = vsyncpa [#allocation3 + $0x1], 0  ;;  %s755_s18 = smov 0   ;;  %s757_s19 = smov 0  }
   0x2   :  { %s759_s20 = smov 0   ;;  %s761_s21 = smov 0  }
   0x3 LB: > { %s776_s22 = sadd.s32 4294967295, %s719_s21   ;;  %s528_s23 = sadd.s32 4294967294, %s719_s21   ;;  %s719_s21 = sphi %s761_s21, %s917_s21   ;;  %s715_s20 = sphi %s759_s20, %s916_s20   ;;  %s711_s19 = sphi %s757_s19, %s915_s19   ;;  %s707_s18 = sphi %s755_s18, %s914_s18  }
   0x4   : > { %s780_s24 = sadd.s32 1, %s719_s21   ;;  %s145_s25 = sadd.s32 1, %s715_s20 }
   0x5   : > { %s142_s26 = ssub.s32 %s719_s21, %s780_s24  ;;  %p155_p0 = scmp.ne.s32.totalorder %s715_s20, %s711_s19 }
   0x6   : > { %p143_p1 = scmp.eq.s32.totalorder %s142_s26, 0  ;;  %p156_p2 = scmp.eq.s32.totalorder %s776_s22, 1 }
   0x7   : > { %p161_p3 = scmp.ne.s32.totalorder %s711_s19, %s707_s18  ;;  %p162_p4 = scmp.eq.s32.totalorder %s528_s23, 1 }
   0x8   : > { %s791_s27 = scalar_select %p143_p1, %s715_s20, %s145_s25  }
   0x9   : > { %p793_p5 = por %p156_p2, %p155_p0  ;;  %p797_p6 = por %p162_p4, %p161_p3 }
   0xa   : > { %p531_p7 = scmp.ge.s32.totalorder %s719_s21, 1  ;;  %p206_p8 = scmp.lt.s32.totalorder %s719_s21, 3 }
   0xc   : > { %p207_p9 = pnand %p531_p7, %p206_p8 }
   0xd   : > { %v250_v0 = vld [vmem:[%s908_s2] sm:$0xff] (!%p207_p9)  ;;  %v251_v1 = vld [vmem:[%s908_s2 + $0x8] sm:$0xff] (!%p207_p9)  ;;  %v252_v2 = vld [vmem:[%s908_s2 + $0x10] sm:$0xff] (!%p207_p9)  ;;  %p239_p10 = scmp.lt.s32.totalorder (!%p207_p9), %s776_s22, 1  ;;  %vm266_vm0 = vcmask (!%p207_p9), 523264   ;;  %v721_v16 = vmov (!%p207_p9), 0.0|0.0  }
   0xe   : > { %210 = sbr.rel (%p207_p9) target bundleno = 484 (0x1e4), region = 40  ;;  %v593_v3 = vpack.c.bf16 (!%p207_p9), %v251_v1, %v250_v0  ;;  %v253_v4 = vld [vmem:[%s908_s2 + $0x18] sm:$0xff] (!%p207_p9)  ;;  %v254_v6 = vld [vmem:[%s908_s2 + $0x20] sm:$0xff] (!%p207_p9)  ;;  %v255_v7 = vld [vmem:[%s908_s2 + $0x28] sm:$0xff] (!%p207_p9)  ;;  %609 = vmatprep.subr.bf16.mxu1 (!%p207_p9), %v721_v16  ;;  %vm722_vm1 = vmmov (!%p207_p9), 0   ;;  %v723_v17 = vmov (!%p207_p9), 0.0  }
   0xf   : > { %v597_v5 = vpack.c.bf16 (!%p207_p9), %v253_v4, %v252_v2  ;;  %v601_v8 = vpack.c.bf16 (!%p207_p9), %v255_v7, %v254_v6  ;;  %v256_v9 = vld [vmem:[%s908_s2 + $0x30] sm:$0xff] (!%p207_p9)  ;;  %v257_v10 = vld [vmem:[%s908_s2 + $0x38] sm:$0xff] (!%p207_p9)  ;;  %590 = vmatprep.mubr.msk.f32.mxu1 (!%p207_p9), %vm722_vm1, %v723_v17  ;;  %v259_v18 = vld [vmem:[%s909_s3 + $0x8] sm:$0xff] (!%p207_p9)  ;;  %vm366_vm2 = vcmask (!%p207_p9), 261120   ;;  %s237_s6 = sand.u32 (!%p207_p9), 1, %s711_s19   ;;  %s539_s10 = sshll.u32 (!%p207_p9), %s776_s22, 4 }
  0x10   : > { %594 = vmatprep.subr.bf16.mxu0 (!%p207_p9), %v593_v3  ;;  %v605_v12 = vpack.c.bf16 (!%p207_p9), %v257_v10, %v256_v9  ;;  %v258_v19 = vld [vmem:[%s909_s3] sm:$0xff] (!%p207_p9)  ;;  %v261_v24 = vld [vmem:[%s909_s3 + $0x18] sm:$0xff] (!%p207_p9)  ;;  %v260_v25 = vld [vmem:[%s909_s3 + $0x10] sm:$0xff] (!%p207_p9)  ;;  %s238_s11 = scalar_lea.vmem (!%p207_p9), [#allocation2], %s237_s6  ;;  %vm440_vm3 = vcmask (!%p207_p9), 253952   ;;  %s864_s15 = scalar_lea.hbm (!%p207_p9), %s911_s5, %s539_s10 }
  0x11   : > { %596 = vmatpush3.bf16.msra.mxu0 (!%p207_p9), %v593_v3  ;;  %s455_s12 = sshll.u32 (!%p207_p9), %s238_s11, 4  ;;  %s866_s12 = int_to_ptr.vmem [resolvable:$true] %s455_s12 }
  0x12   : > { %598 = vmatprep.subr.bf16.mxu0 (!%p207_p9), %v597_v5  ;;  %s657_s16 = scalar_lea.vmem (!%p207_p9), %s866_s12, 16 }
  0x13   : > { %p658_p11 = scmp.ne.s32.totalorder (!%p207_p9), %s866_s12, %s657_s16 }
  0x15   : > { %s823_s17 = scalar_select %p239_p10, %s776_s22, 1  ;;  %600 = vmatpush3.bf16.msra.mxu0 %v597_v5 }
  0x16   : > { %602 = vmatprep.subr.bf16.mxu0 %v601_v8  ;;  %p659_p12 = pnand %p658_p11, %p793_p5  ;;  %s724_s22 = smov [#allocation2]  }
  0x17   : > { %s542_s23 = sshll.u32 %s823_s17, 5  ;;  %s249_s9 = scalar_lea.vmem %s910_s4, %s823_s17 }
  0x18   : > { %s246_s30 = scalar_lea.vmem %s907_s1, %s542_s23  ;;  %v365_v33 = vld [vmem:[%s249_s9] sm:$0x1]  ;;  %p660_p13 = pneg %p659_p12 }
  0x19   : > { %v262_v11 = vld [vmem:[%s246_s30] sm:$0xff]  ;;  %604 = vmatpush3.bf16.msra.mxu0 %v601_v8  ;;  %v263_v13 = vld [vmem:[%s246_s30 + $0x8] sm:$0xff]  ;;  %v264_v14 = vld [vmem:[%s246_s30 + $0x10] sm:$0xff]  ;;  %s661_s23 = sshll.u32 %s724_s22, 4  ;;  %s662_s23 = int_to_ptr.vmem [resolvable:$false] %s661_s23 }
  0x1a   : > { %576 = vmatprep.mubr.msk.f32.mxu0 %vm266_vm0, %v262_v11  ;;  %606 = vmatprep.subr.bf16.mxu0 %v605_v12  ;;  %v265_v15 = vld [vmem:[%s246_s30 + $0x18] sm:$0xff]  ;;  %s241_s30 = scalar_lea.vmem %s906_s0, %s823_s17  ;;  %s443_s17 = scalar_lea.sflag [#allocation3], %s237_s6 }
  0x1b   : > { %v364_v32 = vld [vmem:[%s241_s30] sm:$0x1]  ;;  %s663_s25 = scalar_lea.vmem %s662_s23, 32  ;;  %p664_p0 = scmp.lt.s32.totalorder %s866_s12, %s662_s23 }
  0x1c   : > { %p665_p1 = scmp.lt.s32.totalorder %s663_s25, %s657_s16 }
  0x1d   : > { %608 = vmatpush3.bf16.msra.mxu0 %v605_v12 }
  0x1e   : > { %p666_p2 = por %p665_p1, %p664_p0 }
  0x20   : > { %577 = vmatmul.mubr.msk.f32.vlgmr.msra.gmra.mrb[0].mxu0 %vm266_vm0, %v263_v13  ;;  %p667_p3 = pnand %p666_p2, %p660_p13 }
  0x21   : > { %579 = vmatprep.mubr.msk.f32.mxu0 %vm266_vm0, %v264_v14 }
  0x24   : > { %580 = vmatmul.mubr.msk.f32.gmra.mrb[2].mxu0 %vm266_vm0, %v265_v15 }
  0xf3   : > { %v578_v20 = vpop.f32.mrb[0].mxu0 }
  0xf4   : > { %v351_v21 = vadd.f32 %v578_v20, %v259_v18  ;;  %v345_v22 = vpop.f32.mrb[1].mxu0 }
  0xf5   : > { %v346_v23 = vadd.f32 %v345_v22, %v258_v19 }
  0xf7   : > { %v581_v26 = vpop.f32.mrb[2].mxu0  ;;  %v610_v27 = vpack.c.bf16 %v351_v21, %v346_v23 }
  0xf8   : > { %v361_v28 = vadd.f32 %v581_v26, %v261_v24  ;;  %v355_v29 = vpop.f32.mrb[3].mxu0 }
  0xf9   : > { %v356_v30 = vadd.f32 %v355_v29, %v260_v25  ;;  %611 = vmatpush3.bf16.msra.mxu1 %v610_v27 }
  0xfa   : > { %612 = vmatprep.subr.bf16.mxu1 %v721_v16 }
  0xfb   : > { %v613_v31 = vpack.c.bf16 %v361_v28, %v356_v30 }
  0xfd   : > { %614 = vmatpush3.bf16.msra.mxu1 %v613_v31 }
 0x100   : > { %591 = vmatmul.mubr.msk.f32.vlgmr.msra.gmra.mrb[0].mxu1 %vm366_vm2, %v364_v32 }
 0x1d3   : > { %v436_v34 = vpop.f32.mrb[0].mxu1 }
 0x1d4   : > { %v437_v35 = vadd.f32 %v436_v34, %v365_v33  ;;  %v592_v36 = vpop.f32.mrb[1].mxu1 }
 0x1d6   : > { %441 = vst.msk [vmem:[%s238_s11] sm:$0x1] %vm440_vm3, %v437_v35 }
 0x1d7   : > { %670 = shalt.err (!%p667_p3)
}
 0x1d8   : > { %s671_s26 = scalar_lea.hbm %s864_s15, 16  ;;  %s675_s7 = scalar_lea.hbm %s911_s5, 32 }
 0x1d9   : > { %p672_p4 = scmp.ne.s32.totalorder %s864_s15, %s671_s26  ;;  %p676_p9 = scmp.lt.u32.totalorder %s864_s15, %s911_s5 }
 0x1da   : > { %p677_p10 = scmp.lt.u32.totalorder %s675_s7, %s671_s26  ;;  %p679_p12 = scmp.lt.u32.totalorder %s671_s26, %s864_s15 }
 0x1db   : > { %p673_p7 = pnand %p672_p4, %p793_p5 }
 0x1dc   : > { %p678_p11 = por %p677_p10, %p676_p9 }
 0x1dd   : > { %p674_p8 = pneg %p673_p7 }
 0x1de   : > { %p680_p13 = por %p679_p12, %p678_p11 }
 0x1e0   : > { %p681_p0 = pnand %p680_p13, %p674_p8 }
 0x1e2   : > { %684 = shalt.err (!%p681_p0)
}
 0x1e3   : > { %615 = dma.vmem_to_hbm [thread:$0]  (%p793_p5), %s866_s12, 16, %s864_s15, %s443_s17  }
 0x1e4 PF: > { %p621_p1 = scmp.ge.s32.totalorder %s719_s21, 2  ;;  %s467_s10 = sand.u32 1, %s707_s18  }
 0x1e5   : > { %s468_s11 = scalar_lea.sflag [#allocation3], %s467_s10 }
 0x1e6   : > { %p618_p2 = pnand %p621_p1, %p797_p6 }
 0x1e8   : > { %702 = dma.done.wait (!%p618_p2), %s468_s11, 16  }
 0x1e9   : > { %704 = vsyncadd (!%p618_p2), %s468_s11, 4294967280  ;;  %p15_p3 = scmp.ge.s32.totalorder %s780_s24, 4   ;;  %s914_s18 = smov %s711_s19 }
 0x1ea   : > { %s915_s19 = smov %s715_s20  ;;  %s916_s20 = smov %s791_s27 }
 0x1eb   : > { %s917_s21 = smov %s780_s24  ;;  %17 = sbr.rel (!%p15_p3) target bundleno = 3 (0x3), region = 81 }
 0x1f2   :  { %472 = vsyncpa [#allocation3], 1 }
 0x1f3   :  { %474 = vsyncpa [#allocation3 + $0x1], 1 }

</bundles_post_ra>
